<compile_context>
chip_gen: v6e
topology: v6e:2x2x1
jax: 0.10.0
libtpu: 0.0.40
codegen_flags: <defaults>
</compile_context>

<pallas_src>
import numpy as np
import jax
import jax.numpy as jnp
from jax.experimental import pallas as pl
from jax.experimental.pallas import tpu as pltpu


# ----------------------------------------------------------------------------
# kernels
# ----------------------------------------------------------------------------
def _interp_core(x, xp, table):
    """Shared body: one-hot segment select + fused MXU gather + local t."""
    P = xp.shape[0]
    F = (table.shape[0] - 2) // 2

    # lt[p] = (xp[p] < x); monotone non-increasing along p (xp sorted).
    ltf = (xp < x).astype(jnp.float32)                     # (P, TB)

    # First-difference one-hot over segments [0, P-2]; clamping to the first /
    # last segment falls out of the boundary rows (no sum / clip / iota).
    if P == 2:
        onehot = jnp.ones_like(x)                          # (1, TB)
    else:
        pieces = [1.0 - ltf[1:2, :]]                       # segment 0
        if P > 3:
            pieces.append(ltf[1:P - 2, :] - ltf[2:P - 1, :])
        pieces.append(ltf[P - 2:P - 1, :])                 # segment P-2
        onehot = jnp.concatenate(pieces, axis=0)           # (P-1, TB)

    # Single fused MXU gather: (2F+2, P-1) @ (P-1, TB) -> (2F+2, TB)
    g = jnp.dot(table, onehot, preferred_element_type=jnp.float32)
    fp_lo = g[:F, :]                                       # (F, TB)
    fp_hi = g[F:2 * F, :]                                  # (F, TB)
    xp_lo = g[2 * F:2 * F + 1, :]                          # (1, TB)
    inv_dxp = g[2 * F + 1:2 * F + 2, :]                    # (1, TB), precomputed 1/dxp

    t = (x - xp_lo) * inv_dxp                              # (1, TB)
    return fp_lo, fp_hi, t


def _interp1d_kernel_default(x_ref, xp_ref, table_ref, o_ref):
    """Default fills (left=fp[0], right=fp[-1]): edge handling via clamp of t."""
    x = x_ref[...]                                         # (1, TB)
    fp_lo, fp_hi, t = _interp_core(x, xp_ref[...], table_ref[...])
    t = jnp.clip(t, 0.0, 1.0)                              # 2 ops on (1,TB)
    o_ref[...] = fp_lo + t * (fp_hi - fp_lo)


def _interp1d_kernel_custom(x_ref, xp_ref, table_ref, left_ref, right_ref, o_ref):
    """Custom fills: out-of-range lanes overridden with left/right columns."""
    x = x_ref[...]                                         # (1, TB)
    xp = xp_ref[...]                                       # (P, 1)
    P = xp.shape[0]
    fp_lo, fp_hi, t = _interp_core(x, xp, table_ref[...])
    y = fp_lo + t * (fp_hi - fp_lo)                        # (F, TB)
    below = x < xp[0:1, :]                                 # (1, TB)
    above = x > xp[P - 1:P, :]                             # (1, TB)
    y = jnp.where(below, left_ref[...], y)
    y = jnp.where(above, right_ref[...], y)
    o_ref[...] = y


# ----------------------------------------------------------------------------
# wrapper
# ----------------------------------------------------------------------------
def _round_up(v, m):
    return ((v + m - 1) // m) * m


def _vmem_capacity_bytes():
    try:
        info = pltpu.get_tpu_info()
        for attr in ("vmem_capacity_bytes", "vmem_bytes", "vmem_size_bytes"):
            v = getattr(info, attr, None)
            if v:
                return int(v)
    except Exception:
        pass
    return 64 * 1024 * 1024  # conservative (v7x-sized) default


def interpolator1d_forward(x, xp, fp, left=None, right=None):
    """x: (B,)  xp: (P,)  fp: (P,) or (P, F)  left/right: (F,) or None -> y: (B, F)"""
    x = jnp.asarray(x, jnp.float32)
    xp = jnp.asarray(xp, jnp.float32)
    fp = jnp.asarray(fp, jnp.float32)
    if fp.ndim == 1:
        fp = fp[:, None]
    B = x.shape[0]
    P, F = fp.shape

    use_custom = (left is not None) or (right is not None)
    left_v = fp[0] if left is None else jnp.asarray(left, jnp.float32).reshape(F)
    right_v = fp[-1] if right is None else jnp.asarray(right, jnp.float32).reshape(F)

    if P == 1:
        # np.interp with a single knot: fp[0] everywhere, left/right fills outside.
        y = jnp.broadcast_to(fp[0][None, :], (B, F))
        y = jnp.where((x < xp[0])[:, None], left_v[None, :], y)
        y = jnp.where((x > xp[0])[:, None], right_v[None, :], y)
        return y

    # --- host/XLA-side gather table: [fp_lo | fp_hi | xp_lo | 1/dxp] ----------
    fp_t = fp.T                                            # (F, P)
    dxp = xp[1:] - xp[:-1]                                 # (P-1,)
    # Sanitize duplicate knots: inv=0 -> the degenerate segment returns fp_lo
    # instead of Inf/NaN (np.interp's degenerate-knot behavior differs anyway).
    safe_dxp = jnp.where(dxp != 0, dxp, 1.0)
    inv_dxp = jnp.where(dxp != 0, 1.0 / safe_dxp, 0.0)
    table = jnp.concatenate(
        [fp_t[:, :P - 1],                                  # fp_lo  (F, P-1)
         fp_t[:, 1:],                                      # fp_hi  (F, P-1)
         xp[None, :P - 1],                                 # xp_lo  (1, P-1)
         inv_dxp[None, :]],                                # 1/dxp  (1, P-1)
        axis=0)                                            # (2F+2, P-1)

    # --- generation-aware batch tile (multiple of 256 lanes) ------------------
    vmem_cap = _vmem_capacity_bytes()
    big_vmem = vmem_cap >= 96 * 1024 * 1024                # v5e / v6e (128 MiB)
    budget = (48 if big_vmem else 20) * 1024 * 1024        # intermediates + blocks
    tb_cap = 4096 if big_vmem else 2048
    # rough per-lane footprint: lt + onehot (~2P rows), gather/output temps
    # (~5F rows), double-buffered x / out blocks and slack (~48 rows), f32.
    per_lane_bytes = 4 * (2 * P + 5 * F + 48)
    tb = (budget // per_lane_bytes) // 256 * 256
    tb = max(256, min(tb, tb_cap))
    tb = min(tb, _round_up(B, 256))
    b_pad = _round_up(B, tb)
    vmem_limit = int(min(vmem_cap - 16 * 1024 * 1024, 100 * 1024 * 1024))

    # Pad queries with xp[0] (in-range) so padded lanes never hit edge math.
    x_row = jnp.full((1, b_pad), xp[0], jnp.float32).at[0, :B].set(x)
    xp_col = xp.reshape(P, 1)

    common_in_specs = [
        pl.BlockSpec((1, tb), lambda i: (0, i)),            # x tile (pipelined)
        pl.BlockSpec((P, 1), lambda i: (0, 0)),             # xp (resident)
        pl.BlockSpec((2 * F + 2, P - 1), lambda i: (0, 0)), # gather table (resident)
    ]
    if use_custom:
        kernel = _interp1d_kernel_custom
        in_specs = common_in_specs + [
            pl.BlockSpec((F, 1), lambda i: (0, 0)),         # left
            pl.BlockSpec((F, 1), lambda i: (0, 0)),         # right
        ]
        args = (x_row, xp_col, table, left_v.reshape(F, 1), right_v.reshape(F, 1))
    else:
        kernel = _interp1d_kernel_default
        in_specs = common_in_specs
        args = (x_row, xp_col, table)

    # TODO(synk): for very large P (>~512) chunk the knot axis in-kernel to bound
    # the (P,TB) intermediate; irrelevant at typical control-point counts.
    # TODO(synk): on v7x, CORE_PARALLEL / pl.core_map would shard batch tiles
    # across both TensorCores; kept "parallel" here for cross-generation safety.
    y_t = pl.pallas_call(
        kernel,
        out_shape=jax.ShapeDtypeStruct((F, b_pad), jnp.float32),
        grid_spec=pltpu.PrefetchScalarGridSpec(
            num_scalar_prefetch=0,
            grid=(b_pad // tb,),
            in_specs=in_specs,
            out_specs=pl.BlockSpec((F, tb), lambda i: (0, i)),  # lane-dense out
        ),
        compiler_params=pltpu.CompilerParams(
            dimension_semantics=("parallel",),
            vmem_limit_bytes=vmem_limit,
        ),
    )(*args)

    # TODO(synk): the transpose re-reads the output once in HBM; for large F a
    # (TB, F) block layout would avoid it, omitted to keep a single code path.
    return y_t.T[:B, :]


class Interpolator1D:
    """JAX/Pallas port of torch_bwim Interpolator1D (forward pass only)."""

    def __init__(self, xp, fp, grad_fp=None):
        xp = jnp.asarray(xp, jnp.float32)
        fp = jnp.asarray(fp, jnp.float32)
        fp = fp[:, None] if fp.ndim == 1 else fp
        if grad_fp is None:
            # numerical gradient of fp w.r.t. xp; only used by the torch backward,
            # kept for structural parity.
            grad_fp = np.gradient(np.asarray(fp), np.asarray(xp), axis=0)
        grad_fp = jnp.asarray(grad_fp, jnp.float32)
        grad_fp = grad_fp[:, None] if grad_fp.ndim == 1 else grad_fp
        self._xp = xp
        self._fp = fp
        self._grad_fp = grad_fp
        self._left = fp[0]
        self._right = fp[-1]

    def __call__(self, x, left=None, right=None):
        # None -> default fills (fp[0]/fp[-1]); handled by the fast clamp kernel.
        return interpolator1d_forward(x, self._xp, self._fp, left, right)

    # TODO(synk): custom backward (Interpolator1DFunction.backward using grad_fp)
    # is not implemented; only the forward pass is ported.


if __name__ == "__main__":
    key = jax.random.PRNGKey(0)
    k_x, k_fp = jax.random.split(key)

    B, P, F = 16, 8, 4
    xp = jnp.linspace(-1.0, 1.0, P).astype(jnp.float32)           # sorted control points
    fp = jax.random.normal(k_fp, (P, F), dtype=jnp.float32)       # F independent functions
    x = jax.random.uniform(k_x, (B,), minval=-1.5, maxval=1.5,
                           dtype=jnp.float32)                     # includes out-of-range

    x_np, xp_np, fp_np = np.asarray(x), np.asarray(xp), np.asarray(fp)
    interp = Interpolator1D(xp=xp, fp=fp, grad_fp=None)

    # --- default fills (left=fp[0], right=fp[-1]) : clamp fast-path -----------
    y = jax.block_until_ready(interp(x))
    ref = np.stack(
        [np.interp(x_np, xp_np, fp_np[:, f],
                   left=fp_np[0, f], right=fp_np[-1, f]) for f in range(F)],
        axis=-1).astype(np.float32)
    np.testing.assert_allclose(np.asarray(y), ref, rtol=1e-5, atol=1e-5)

    # --- custom fills : select path -------------------------------------------
    left = jnp.array([10.0, 20.0, 30.0, 40.0], jnp.float32)
    right = -left
    y_c = jax.block_until_ready(interp(x, left=left, right=right))
    ref_c = np.stack(
        [np.interp(x_np, xp_np, fp_np[:, f],
                   left=float(left[f]), right=float(right[f])) for f in range(F)],
        axis=-1).astype(np.float32)
    np.testing.assert_allclose(np.asarray(y_c), ref_c, rtol=1e-5, atol=1e-5)

    print("KERNEL_OK")
</pallas_src>

<mosaic_0001>
module attributes {stable_mosaic.version = 11 : i64} {
  func.func @_interp1d_kernel_default(%arg0: i32, %arg1: memref<1x256xf32, #tpu.memory_space<vmem>>, %arg2: memref<8x1xf32, #tpu.memory_space<vmem>>, %arg3: memref<10x7xf32, #tpu.memory_space<vmem>>, %arg4: memref<4x256xf32, #tpu.memory_space<vmem>>) attributes {dimension_semantics = [#tpu.dimension_semantics<parallel>], iteration_bounds = array<i64: 1>, scalar_prefetch = 0 : i64, scratch_operands = 0 : i64, tpu.core_type = #tpu.core_type<tc>, window_params = [{transform_indices = @transform_0, window_bounds = array<i64: 1, 256>}, {pipeline_mode = #tpu.pipeline_mode<synchronous>, transform_indices = @transform_1, window_bounds = array<i64: 8, 1>}, {pipeline_mode = #tpu.pipeline_mode<synchronous>, transform_indices = @transform_2, window_bounds = array<i64: 10, 7>}, {transform_indices = @transform_3, window_bounds = array<i64: 4, 256>}]} {
    %c0 = arith.constant 0 : index
    %c0_0 = arith.constant 0 : index
    %0 = vector.load %arg1[%c0, %c0_0] : memref<1x256xf32, #tpu.memory_space<vmem>>, vector<1x256xf32>
    %c0_1 = arith.constant 0 : index
    %c0_2 = arith.constant 0 : index
    %1 = vector.load %arg2[%c0_1, %c0_2] : memref<8x1xf32, #tpu.memory_space<vmem>>, vector<8x1xf32>
    %c0_3 = arith.constant 0 : index
    %c0_4 = arith.constant 0 : index
    %2 = vector.load %arg3[%c0_3, %c0_4] : memref<10x7xf32, #tpu.memory_space<vmem>>, vector<10x7xf32>
    %3 = vector.broadcast %1 : vector<8x1xf32> to vector<8x256xf32>
    %4 = vector.broadcast %0 : vector<1x256xf32> to vector<8x256xf32>
    %5 = arith.cmpf olt, %3, %4 : vector<8x256xf32>
    %6 = arith.extui %5 : vector<8x256xi1> to vector<8x256xi32>
    %7 = arith.sitofp %6 : vector<8x256xi32> to vector<8x256xf32>
    %8 = vector.extract_strided_slice %7 {offsets = [1, 0], sizes = [1, 256], strides = [1, 1]} : vector<8x256xf32> to vector<1x256xf32>
    %cst = arith.constant 1.000000e+00 : f32
    %9 = vector.broadcast %cst : f32 to vector<1x256xf32>
    %10 = arith.subf %9, %8 : vector<1x256xf32>
    %11 = vector.extract_strided_slice %7 {offsets = [1, 0], sizes = [5, 256], strides = [1, 1]} : vector<8x256xf32> to vector<5x256xf32>
    %12 = vector.extract_strided_slice %7 {offsets = [2, 0], sizes = [5, 256], strides = [1, 1]} : vector<8x256xf32> to vector<5x256xf32>
    %13 = arith.subf %11, %12 : vector<5x256xf32>
    %14 = vector.extract_strided_slice %7 {offsets = [6, 0], sizes = [1, 256], strides = [1, 1]} : vector<8x256xf32> to vector<1x256xf32>
    %15 = tpu.concatenate %10, %13, %14 in 0 : vector<1x256xf32>, vector<5x256xf32>, vector<1x256xf32> -> vector<7x256xf32>
    %cst_5 = arith.constant dense<0.000000e+00> : vector<10x256xf32>
    %16 = tpu.matmul %2, %15, %cst_5 {dimension_numbers = #tpu.dot_dimension_numbers<[1], [0], [0], [1], [0, 0, 1, 1], [], []>} : vector<10x7xf32>, vector<7x256xf32>, vector<10x256xf32> -> vector<10x256xf32>
    %17 = vector.extract_strided_slice %16 {offsets = [0, 0], sizes = [4, 256], strides = [1, 1]} : vector<10x256xf32> to vector<4x256xf32>
    %18 = vector.extract_strided_slice %16 {offsets = [4, 0], sizes = [4, 256], strides = [1, 1]} : vector<10x256xf32> to vector<4x256xf32>
    %19 = vector.extract_strided_slice %16 {offsets = [8, 0], sizes = [1, 256], strides = [1, 1]} : vector<10x256xf32> to vector<1x256xf32>
    %20 = vector.extract_strided_slice %16 {offsets = [9, 0], sizes = [1, 256], strides = [1, 1]} : vector<10x256xf32> to vector<1x256xf32>
    %21 = arith.subf %0, %19 : vector<1x256xf32>
    %22 = arith.mulf %21, %20 : vector<1x256xf32>
    %cst_6 = arith.constant 0.000000e+00 : f32
    %cst_7 = arith.constant 1.000000e+00 : f32
    %23 = vector.broadcast %cst_6 : f32 to vector<1x256xf32>
    %24 = arith.maximumf %23, %22 : vector<1x256xf32>
    %25 = vector.broadcast %cst_7 : f32 to vector<1x256xf32>
    %26 = arith.minimumf %25, %24 : vector<1x256xf32>
    %27 = arith.subf %18, %17 : vector<4x256xf32>
    %28 = vector.broadcast %26 : vector<1x256xf32> to vector<4x256xf32>
    %29 = arith.mulf %28, %27 : vector<4x256xf32>
    %30 = arith.addf %17, %29 : vector<4x256xf32>
    %c0_8 = arith.constant 0 : index
    %c0_9 = arith.constant 0 : index
    %31 = vector.load %arg4[%c0_8, %c0_9] : memref<4x256xf32, #tpu.memory_space<vmem>>, vector<4x256xf32>
    tpu.vector_store %arg4[%c0_8, %c0_9], %30 {strides = array<i32>} : memref<4x256xf32, #tpu.memory_space<vmem>>, vector<4x256xf32>,
    return
  }
  func.func @transform_0(%arg0: i32) -> (i32, i32) {
    %c0_i32 = arith.constant 0 : i32
    %c0_i32_0 = arith.constant 0 : i32
    return %c0_i32, %arg0 : i32, i32
  }
  func.func @transform_1(%arg0: i32) -> (i32, i32) {
    %c0_i32 = arith.constant 0 : i32
    %c0_i32_0 = arith.constant 0 : i32
    %c0_i32_1 = arith.constant 0 : i32
    return %c0_i32, %c0_i32_0 : i32, i32
  }
  func.func @transform_2(%arg0: i32) -> (i32, i32) {
    %c0_i32 = arith.constant 0 : i32
    %c0_i32_0 = arith.constant 0 : i32
    %c0_i32_1 = arith.constant 0 : i32
    return %c0_i32, %c0_i32_0 : i32, i32
  }
  func.func @transform_3(%arg0: i32) -> (i32, i32) {
    %c0_i32 = arith.constant 0 : i32
    %c0_i32_0 = arith.constant 0 : i32
    return %c0_i32, %arg0 : i32, i32
  }
}

</mosaic_0001>

<bundles_post_ra>
// kernel: tpu_custom_call.1
= control target key start
LH: loop header
LB: loop body
LE: loop exit
PB: predicated region body
PF: predicated region fallthrough
CT: control target
= control target key end

     0   :  { %v268_v1 = vmov 0   ;;  %v269_v2 = vmov 0.0   ;;  %s307_s0 = inlined_call_operand.vmem [shape: f32[1,256], index: 0, kind: input, shape index: {}]   ;;  %s308_s1 = inlined_call_operand.vmem [shape: f32[8,1], index: 1, kind: input, shape index: {}]   ;;  %s309_s2 = inlined_call_operand.vmem [shape: f32[10,7], index: 2, kind: input, shape index: {}]   ;;  %s310_s3 = inlined_call_operand.hbm [shape: f32[4,256], index: 3, kind: output, shape index: {}]  }
   0x1   :  { %v16_v0 = vld [vmem:[%s308_s1] sm:$0xff]  ;;  %245 = vset.pattern.permute.xlu0 %v268_v1  ;;  %147 = vmatprep.mubr.f32.mxu1 %v269_v2 }
   0x2   :  { %8 = vsyncpa [#allocation3], 0  ;;  %21 = vperm.xlu0 %245, %v16_v0   ;;  %141 = vmatprep.mubr.f32.mxu0 %v269_v2  ;;  %v25_v3 = vlaneseq  ;;  %v15_v7 = vld [vmem:[%s307_s0] sm:$0x3]  ;;  %vm57_vm2 = vcmask 1040384   ;;  %vm60_vm3 = vcmask 1045504  }
   0x3   :  { %vm70_vm4 = vcmask 1046528   ;;  %v18_v25 = vld [vmem:[%s309_s2 + $0x8] sm:$0x3]  ;;  %vm63_vm5 = vcmask 56320   ;;  %v17_v26 = vld [vmem:[%s309_s2] sm:$0xff]  ;;  %s271_s2 = smov [#allocation2]  }
   0x4   :  { %v26_v4 = vshrl.u32 %v25_v3, 7  ;;  %v270_v27 = vmov 1966171168   ;;  %s225_s18 = sshll.u32 %s271_s2, 4  ;;  %s226_s18 = int_to_ptr.vmem [resolvable:$true] %s225_s18 }
   0x5   :  { %v158_v28 = vunpack.c.l.s4 %v270_v27  ;;  %s246_s19 = scalar_lea.vmem %s226_s18, 128  ;;  %p251_p1 = scmp.lt.s32.totalorder %s226_s18, %s226_s18 }
   0x6   :  { %v27_v5 = vsub.s32 0, %v26_v4  ;;  %v31_v6 = vsub.s32 1, %v26_v4  ;;  %p247_p0 = scmp.ne.s32.totalorder %s226_s18, %s246_s19  ;;  %p252_p2 = scmp.lt.s32.totalorder %s246_s19, %s246_s19 }
   0x7   :  { %v159_v29 = vunpack.c.0.s8 %v158_v28 }
   0x8   :  { %v28_v8 = vrot.slane %v15_v7, %v27_v5  ;;  %v32_v9 = vrot.slane %v15_v7, %v31_v6  ;;  %p253_p3 = por %p252_p2, %p251_p1 }
   0x9   :  { %v162_v31 = vsub.s32 %v159_v29, %v26_v4 }
   0xa   :  { %p254_p4 = pnand %p253_p3, %p247_p0 }
  0x7d   :  { %v22_v10 = vpop.permute.xlu0 %21 }
  0x7e   :  { %vm35_vm0 = vcmp.lt.f32.partialorder %v22_v10, %v28_v8  ;;  %vm36_vm1 = vcmp.lt.f32.partialorder %v22_v10, %v32_v9 }
  0x7f   :  { %v233_v11 = vsel %vm35_vm0, 1.0, %v269_v2  ;;  %v234_v12 = vsel %vm36_vm1, 1.0, %v269_v2 }
  0x80   :  { %v41_v13 = vsub.f32 1.0, %v233_v11  ;;  %v42_v14 = vsub.f32 1.0, %v234_v12  ;;  %v45_v15 = vrot.slane %v233_v11, 1  ;;  %v46_v16 = vrot.slane %v234_v12, 1 }
  0x82   :  { %v49_v17 = vsub.f32 %v233_v11, %v45_v15  ;;  %v50_v18 = vsub.f32 %v234_v12, %v46_v16  ;;  %v53_v19 = vrot.slane %v41_v13, 1  ;;  %v54_v20 = vrot.slane %v42_v14, 1 }
  0x84   :  { %v59_v21 = vsel %vm57_vm2, %v54_v20, %v50_v18  ;;  %v58_v22 = vsel %vm57_vm2, %v53_v19, %v49_v17 }
  0x85   :  { %v62_v23 = vsel %vm60_vm3, %v59_v21, %v234_v12  ;;  %v61_v24 = vsel %vm60_vm3, %v58_v22, %v233_v11 }
  0x86   :  { %235 = vmatprep.subr.msk.mxu0 %vm70_vm4, %v62_v23  ;;  %239 = vmatprep.subr.msk.mxu1 %vm70_vm4, %v62_v23 }
  0x87   :  { %236 = vmatpush1.msk.msra.mxu0 %vm70_vm4, %v61_v24  ;;  %240 = vmatpush1.msk.msra.mxu1 %vm70_vm4, %v61_v24 }
  0x88   :  { %238 = vmatmul.mubr.msk.f32.vlgmr.msra.gmra.mxu1 %vm63_vm5, %v18_v25  ;;  %237 = vmatmul.mubr.msk.f32.vlgmr.msra.gmra.mxu0 %vm63_vm5, %v17_v26 }
 0x148   :  { %v149_v30 = vpop.f32.mrf.mxu1  ;;  %v143_v35 = vpop.f32.mrf.mxu0 }
 0x149   :  { %v187_v43 = vrot.slane %v143_v35, 4 }
 0x14a   :  { %v151_v32 = vpop.f32.mrf.mxu1  ;;  %v145_v40 = vpop.f32.mrf.mxu0 }
 0x14b   :  { %v156_v33 = vcombine.low %v149_v30, %v151_v32  ;;  %v188_v44 = vrot.slane %v145_v40, 4  ;;  %v191_v46 = vsub.f32 %v143_v35, %v187_v43 }
 0x14d   :  { %v163_v34 = vrot.slane %v156_v33, %v162_v31  ;;  %v192_v48 = vsub.f32 %v145_v40, %v188_v44 }
 0x14f   :  { %v170_v36 = vrot.slane %v163_v34, %v162_v31  ;;  %v173_v37 = vcombine.high %v163_v34, %v163_v34 }
 0x151   :  { %v172_v38 = vsub.f32 %v15_v7, %v170_v36  ;;  %v180_v39 = vrot.slane %v173_v37, %v162_v31 }
 0x153   :  { %v182_v41 = vmul.f32 %v180_v39, %v172_v38 }
 0x155   :  { %v183_v42 = vmax.f32 %v182_v41, 0.0 }
 0x157   :  { %v184_v45 = vmin.f32 %v183_v42, 1.0 }
 0x159   :  { %v197_v47 = vrot.slane %v184_v45, %v27_v5  ;;  %v201_v49 = vrot.slane %v184_v45, %v31_v6 }
 0x15b   :  { %v204_v50 = vmul.f32 %v197_v47, %v191_v46  ;;  %v205_v51 = vmul.f32 %v201_v49, %v192_v48 }
 0x15d   :  { %v208_v52 = vrot.slane %v204_v50, 4  ;;  %v209_v53 = vrot.slane %v205_v51, 4 }
 0x15f   :  { %v212_v54 = vadd.f32 %v208_v52, %v143_v35  ;;  %v213_v55 = vadd.f32 %v209_v53, %v145_v40 }
 0x161   :  { %v216_v56 = vcombine.low %v212_v54, %v213_v55 }
 0x163   :  { %218 = vst [vmem:[#allocation2] sm:$0xff] %v216_v56 }
 0x164   :  { %257 = shalt.err (!%p254_p4)
}
 0x165   :  { %228 = dma.vmem_to_hbm [thread:$0]  %s226_s18, 128, %s310_s3, [#allocation3]  }
 0x166   :  { %266 = dma.done.wait [#allocation3], 128  }
 0x167   :  { %267 = vsyncadd [#allocation3], 4294967168 }
 0x168   :  { %232 = vsyncpa [#allocation3], 1 }

</bundles_post_ra>
